<compile_context>
chip_gen: v7x
topology: tpu7x:2x2x1
jax: 0.10.0
libtpu: 0.0.40
codegen_flags: <defaults>
</compile_context>

<pallas_src>
import functools

import jax
import jax.numpy as jnp
from jax.experimental import pallas as pl
from jax.experimental.pallas import tpu as pltpu

INPUT_SIZE = 100
HIDDEN_SIZE = 128
OUT_SIZE = 2

_SUBLANE = 8


def _round_up(x, m):
    return ((x + m - 1) // m) * m


def _leaky_relu(x, slope=0.2):
    # maximum(x, 0.2*x): 2 VALU ops/element vs 3 for cmp+mul+select.
    return jnp.maximum(x, slope * x)


def generator_kernel(z_ref,
                     w1_ref, b1_ref,
                     w2_ref, b2_ref,
                     w3_ref, b3_ref,
                     w4_ref, b4_ref,
                     o_ref):
    """One batch tile of the full 4-layer MLP.

    Matmuls use the weight dtype (bf16 by default) with f32 accumulation; the
    bias-add + LeakyReLU epilogue runs in the bias dtype (bf16 on v6e/v7x,
    f32 for the strict-check / v5e path).
    """
    cd = w1_ref.dtype            # matmul operand dtype
    ad = b1_ref.dtype            # epilogue (activation) dtype

    # In-kernel cast of the (tb, 100) f32 input tile; the K=100 contraction is
    # zero-padded internally by the compiler, so no wrapper-side pad of z.
    x = z_ref[...].astype(cd)

    h = jnp.dot(x, w1_ref[...], preferred_element_type=jnp.float32)
    h = _leaky_relu(h.astype(ad) + b1_ref[...]).astype(cd)

    h = jnp.dot(h, w2_ref[...], preferred_element_type=jnp.float32)
    h = _leaky_relu(h.astype(ad) + b2_ref[...]).astype(cd)

    h = jnp.dot(h, w3_ref[...], preferred_element_type=jnp.float32)
    h = _leaky_relu(h.astype(ad) + b3_ref[...]).astype(cd)

    out = jnp.dot(h, w4_ref[...], preferred_element_type=jnp.float32) + b4_ref[...]
    o_ref[...] = out.astype(o_ref.dtype)


@functools.partial(jax.jit,
                   static_argnames=("block_batch", "compute_dtype", "act_dtype"))
def generator_forward(z, params, *, block_batch=2048,
                      compute_dtype=jnp.bfloat16, act_dtype=None):
    """z: (B, 100) float32 -> (B, 2) float32.

    compute_dtype: matmul operand dtype (bf16 default; f32 for strict check).
    act_dtype:     bias-add/LeakyReLU dtype.  Defaults to compute_dtype
                   (bf16 epilogue is a VPU win on v6e/v7x); pass jnp.float32
                   on v5e, which has no bf16 VALU.
    """
    if act_dtype is None:
        act_dtype = compute_dtype

    (w1, b1), (w2, b2), (w3, b3), (w4, b4) = params
    B, in_f = z.shape
    h1 = w1.shape[1]          # 128
    h2 = w2.shape[1]          # 256
    h3 = w3.shape[1]          # 256
    out_f = w4.shape[1]       # 2

    cd = jnp.dtype(compute_dtype)
    ad = jnp.dtype(act_dtype)

    # Weights in the matmul dtype, hidden biases in the epilogue dtype, final
    # bias in f32 (output is f32 and only 2 wide).
    w1_c, w2_c, w3_c, w4_c = (w1.astype(cd), w2.astype(cd),
                              w3.astype(cd), w4.astype(cd))
    b1_c, b2_c, b3_c = (b1.astype(ad), b2.astype(ad), b3.astype(ad))
    b4_f = b4.astype(jnp.float32)

    # Batch tile: multiple of 8 sublanes; cap so the grid has >= 2 steps when
    # B allows it (both v7x TensorCores get work via "parallel" semantics).
    tb = min(block_batch, _round_up(B, _SUBLANE))
    if B >= 2 * _SUBLANE:
        tb = min(tb, _round_up(pl.cdiv(B, 2), _SUBLANE))
    grid = (pl.cdiv(B, tb),)   # ragged final block handled by the pipeline

    weight_elems = in_f * h1 + h1 * h2 + h2 * h3 + h3 * out_f
    flops = 2 * B * weight_elems
    bytes_accessed = (
        B * in_f * 4                                   # z in (f32)
        + B * out_f * 4                                # out (f32, narrow)
        + weight_elems * cd.itemsize                   # weights (read once)
        + (h1 + h2 + h3) * ad.itemsize + out_f * 4     # biases
    )

    const = lambda shape: pl.BlockSpec(shape, lambda i: (0, 0))

    out = pl.pallas_call(
        generator_kernel,
        out_shape=jax.ShapeDtypeStruct((B, out_f), jnp.float32),
        grid=grid,
        in_specs=[
            pl.BlockSpec((tb, in_f), lambda i: (i, 0)),   # z tile (unpadded)
            const((in_f, h1)),  const((1, h1)),           # layer 1 (VMEM-resident)
            const((h1, h2)),    const((1, h2)),           # layer 2
            const((h2, h3)),    const((1, h3)),           # layer 3
            const((h3, out_f)), const((1, out_f)),        # layer 4
        ],
        out_specs=pl.BlockSpec((tb, out_f), lambda i: (i, 0)),
        compiler_params=pltpu.CompilerParams(
            dimension_semantics=("parallel",),
            vmem_limit_bytes=32 * 1024 * 1024,
        ),
        cost_estimate=pl.CostEstimate(
            flops=flops, bytes_accessed=bytes_accessed, transcendentals=0),
    )(z, w1_c, b1_c, w2_c, b2_c, w3_c, b3_c, w4_c, b4_f)

    return out


def init_params(key, input_size=INPUT_SIZE, hidden_size=HIDDEN_SIZE):
    """Deterministic init mimicking torch.nn.Linear (uniform +-1/sqrt(fan_in))."""
    dims = [
        (input_size, hidden_size),
        (hidden_size, hidden_size * 2),
        (hidden_size * 2, hidden_size * 2),
        (hidden_size * 2, OUT_SIZE),
    ]
    params = []
    for (fan_in, fan_out) in dims:
        key, kw, kb = jax.random.split(key, 3)
        bound = 1.0 / (fan_in ** 0.5)
        # Stored as (in, out) so the kernel computes x @ W + b.
        w = jax.random.uniform(kw, (fan_in, fan_out), jnp.float32, -bound, bound)
        b = jax.random.uniform(kb, (1, fan_out), jnp.float32, -bound, bound)
        params.append((w, b))
    return params


def reference_forward(z, params):
    x = z
    for i, (w, b) in enumerate(params):
        x = x @ w + b
        if i < len(params) - 1:
            x = jnp.where(x >= 0, x, 0.2 * x)
    return x


if __name__ == "__main__":
    key = jax.random.PRNGKey(0)
    k_params, k_z = jax.random.split(key)
    params = init_params(k_params)

    # batch=8 : single grid step.  batch=20 : multi-step grid + ragged final block.
    for batch in (8, 20):
        z = jax.random.normal(jax.random.fold_in(k_z, batch),
                              (batch, INPUT_SIZE), jnp.float32)
        ref = jax.block_until_ready(reference_forward(z, params))

        # Strict check: f32 compute path must match the reference tightly.
        out_f32 = jax.block_until_ready(
            generator_forward(z, params, compute_dtype=jnp.float32))
        assert out_f32.shape == (batch, OUT_SIZE)
        assert jnp.allclose(out_f32, ref, atol=1e-5, rtol=1e-5)

        # Default path (bf16 matmul operands + bf16 epilogue, f32 accumulate).
        out_bf16 = jax.block_until_ready(generator_forward(z, params))
        assert out_bf16.shape == (batch, OUT_SIZE)
        assert jnp.allclose(out_bf16, ref, atol=5e-2, rtol=5e-2)

    print("KERNEL_OK")
</pallas_src>

<mosaic_0001>
module attributes {stable_mosaic.version = 11 : i64} {
  func.func @generator_kernel(%arg0: i32, %arg1: memref<8x100xf32, #tpu.memory_space<vmem>>, %arg2: memref<100x128xf32, #tpu.memory_space<vmem>>, %arg3: memref<1x128xf32, #tpu.memory_space<vmem>>, %arg4: memref<128x256xf32, #tpu.memory_space<vmem>>, %arg5: memref<1x256xf32, #tpu.memory_space<vmem>>, %arg6: memref<256x256xf32, #tpu.memory_space<vmem>>, %arg7: memref<1x256xf32, #tpu.memory_space<vmem>>, %arg8: memref<256x2xf32, #tpu.memory_space<vmem>>, %arg9: memref<1x2xf32, #tpu.memory_space<vmem>>, %arg10: memref<8x2xf32, #tpu.memory_space<vmem>>) attributes {dimension_semantics = [#tpu.dimension_semantics<parallel>], iteration_bounds = array<i64: 1>, scalar_prefetch = 0 : i64, scratch_operands = 0 : i64, tpu.core_type = #tpu.core_type<tc>, window_params = [{transform_indices = @transform_0, window_bounds = array<i64: 8, 100>}, {pipeline_mode = #tpu.pipeline_mode<synchronous>, transform_indices = @transform_1, window_bounds = array<i64: 100, 128>}, {pipeline_mode = #tpu.pipeline_mode<synchronous>, transform_indices = @transform_2, window_bounds = array<i64: 1, 128>}, {pipeline_mode = #tpu.pipeline_mode<synchronous>, transform_indices = @transform_3, window_bounds = array<i64: 128, 256>}, {pipeline_mode = #tpu.pipeline_mode<synchronous>, transform_indices = @transform_4, window_bounds = array<i64: 1, 256>}, {pipeline_mode = #tpu.pipeline_mode<synchronous>, transform_indices = @transform_5, window_bounds = array<i64: 256, 256>}, {pipeline_mode = #tpu.pipeline_mode<synchronous>, transform_indices = @transform_6, window_bounds = array<i64: 1, 256>}, {pipeline_mode = #tpu.pipeline_mode<synchronous>, transform_indices = @transform_7, window_bounds = array<i64: 256, 2>}, {pipeline_mode = #tpu.pipeline_mode<synchronous>, transform_indices = @transform_8, window_bounds = array<i64: 1, 2>}, {transform_indices = @transform_9, window_bounds = array<i64: 8, 2>}]} {
    %c0 = arith.constant 0 : index
    %c0_0 = arith.constant 0 : index
    %0 = vector.load %arg1[%c0, %c0_0] : memref<8x100xf32, #tpu.memory_space<vmem>>, vector<8x100xf32>
    %c0_1 = arith.constant 0 : index
    %c0_2 = arith.constant 0 : index
    %1 = vector.load %arg2[%c0_1, %c0_2] : memref<100x128xf32, #tpu.memory_space<vmem>>, vector<100x128xf32>
    %cst = arith.constant dense<0.000000e+00> : vector<8x128xf32>
    %2 = tpu.matmul %0, %1, %cst {dimension_numbers = #tpu.dot_dimension_numbers<[1], [0], [0], [1], [0, 0, 1, 1], [], []>} : vector<8x100xf32>, vector<100x128xf32>, vector<8x128xf32> -> vector<8x128xf32>
    %c0_3 = arith.constant 0 : index
    %c0_4 = arith.constant 0 : index
    %3 = vector.load %arg3[%c0_3, %c0_4] : memref<1x128xf32, #tpu.memory_space<vmem>>, vector<1x128xf32>
    %4 = vector.broadcast %3 : vector<1x128xf32> to vector<8x128xf32>
    %5 = arith.addf %2, %4 : vector<8x128xf32>
    %cst_5 = arith.constant 2.000000e-01 : f32
    %6 = vector.broadcast %cst_5 : f32 to vector<8x128xf32>
    %7 = arith.mulf %6, %5 : vector<8x128xf32>
    %8 = arith.maximumf %5, %7 : vector<8x128xf32>
    %c0_6 = arith.constant 0 : index
    %c0_7 = arith.constant 0 : index
    %9 = vector.load %arg4[%c0_6, %c0_7] : memref<128x256xf32, #tpu.memory_space<vmem>>, vector<128x256xf32>
    %cst_8 = arith.constant dense<0.000000e+00> : vector<8x256xf32>
    %10 = tpu.matmul %8, %9, %cst_8 {dimension_numbers = #tpu.dot_dimension_numbers<[1], [0], [0], [1], [0, 0, 1, 1], [], []>} : vector<8x128xf32>, vector<128x256xf32>, vector<8x256xf32> -> vector<8x256xf32>
    %c0_9 = arith.constant 0 : index
    %c0_10 = arith.constant 0 : index
    %11 = vector.load %arg5[%c0_9, %c0_10] : memref<1x256xf32, #tpu.memory_space<vmem>>, vector<1x256xf32>
    %12 = vector.broadcast %11 : vector<1x256xf32> to vector<8x256xf32>
    %13 = arith.addf %10, %12 : vector<8x256xf32>
    %cst_11 = arith.constant 2.000000e-01 : f32
    %14 = vector.broadcast %cst_11 : f32 to vector<8x256xf32>
    %15 = arith.mulf %14, %13 : vector<8x256xf32>
    %16 = arith.maximumf %13, %15 : vector<8x256xf32>
    %c0_12 = arith.constant 0 : index
    %c0_13 = arith.constant 0 : index
    %17 = vector.load %arg6[%c0_12, %c0_13] : memref<256x256xf32, #tpu.memory_space<vmem>>, vector<256x256xf32>
    %cst_14 = arith.constant dense<0.000000e+00> : vector<8x256xf32>
    %18 = tpu.matmul %16, %17, %cst_14 {dimension_numbers = #tpu.dot_dimension_numbers<[1], [0], [0], [1], [0, 0, 1, 1], [], []>} : vector<8x256xf32>, vector<256x256xf32>, vector<8x256xf32> -> vector<8x256xf32>
    %c0_15 = arith.constant 0 : index
    %c0_16 = arith.constant 0 : index
    %19 = vector.load %arg7[%c0_15, %c0_16] : memref<1x256xf32, #tpu.memory_space<vmem>>, vector<1x256xf32>
    %20 = vector.broadcast %19 : vector<1x256xf32> to vector<8x256xf32>
    %21 = arith.addf %18, %20 : vector<8x256xf32>
    %cst_17 = arith.constant 2.000000e-01 : f32
    %22 = vector.broadcast %cst_17 : f32 to vector<8x256xf32>
    %23 = arith.mulf %22, %21 : vector<8x256xf32>
    %24 = arith.maximumf %21, %23 : vector<8x256xf32>
    %c0_18 = arith.constant 0 : index
    %c0_19 = arith.constant 0 : index
    %25 = vector.load %arg8[%c0_18, %c0_19] : memref<256x2xf32, #tpu.memory_space<vmem>>, vector<256x2xf32>
    %cst_20 = arith.constant dense<0.000000e+00> : vector<8x2xf32>
    %26 = tpu.matmul %24, %25, %cst_20 {dimension_numbers = #tpu.dot_dimension_numbers<[1], [0], [0], [1], [0, 0, 1, 1], [], []>} : vector<8x256xf32>, vector<256x2xf32>, vector<8x2xf32> -> vector<8x2xf32>
    %c0_21 = arith.constant 0 : index
    %c0_22 = arith.constant 0 : index
    %27 = vector.load %arg9[%c0_21, %c0_22] : memref<1x2xf32, #tpu.memory_space<vmem>>, vector<1x2xf32>
    %28 = vector.broadcast %27 : vector<1x2xf32> to vector<8x2xf32>
    %29 = arith.addf %26, %28 : vector<8x2xf32>
    %c0_23 = arith.constant 0 : index
    %c0_24 = arith.constant 0 : index
    %30 = vector.load %arg10[%c0_23, %c0_24] : memref<8x2xf32, #tpu.memory_space<vmem>>, vector<8x2xf32>
    tpu.vector_store %arg10[%c0_23, %c0_24], %29 {strides = array<i32>} : memref<8x2xf32, #tpu.memory_space<vmem>>, vector<8x2xf32>,
    return
  }
  func.func @transform_0(%arg0: i32) -> (i32, i32) {
    %c0_i32 = arith.constant 0 : i32
    %c0_i32_0 = arith.constant 0 : i32
    return %arg0, %c0_i32 : i32, i32
  }
  func.func @transform_1(%arg0: i32) -> (i32, i32) {
    %c0_i32 = arith.constant 0 : i32
    %c0_i32_0 = arith.constant 0 : i32
    %c0_i32_1 = arith.constant 0 : i32
    return %c0_i32, %c0_i32_0 : i32, i32
  }
  func.func @transform_2(%arg0: i32) -> (i32, i32) {
    %c0_i32 = arith.constant 0 : i32
    %c0_i32_0 = arith.constant 0 : i32
    %c0_i32_1 = arith.constant 0 : i32
    return %c0_i32, %c0_i32_0 : i32, i32
  }
  func.func @transform_3(%arg0: i32) -> (i32, i32) {
    %c0_i32 = arith.constant 0 : i32
    %c0_i32_0 = arith.constant 0 : i32
    %c0_i32_1 = arith.constant 0 : i32
    return %c0_i32, %c0_i32_0 : i32, i32
  }
  func.func @transform_4(%arg0: i32) -> (i32, i32) {
    %c0_i32 = arith.constant 0 : i32
    %c0_i32_0 = arith.constant 0 : i32
    %c0_i32_1 = arith.constant 0 : i32
    return %c0_i32, %c0_i32_0 : i32, i32
  }
  func.func @transform_5(%arg0: i32) -> (i32, i32) {
    %c0_i32 = arith.constant 0 : i32
    %c0_i32_0 = arith.constant 0 : i32
    %c0_i32_1 = arith.constant 0 : i32
    return %c0_i32, %c0_i32_0 : i32, i32
  }
  func.func @transform_6(%arg0: i32) -> (i32, i32) {
    %c0_i32 = arith.constant 0 : i32
    %c0_i32_0 = arith.constant 0 : i32
    %c0_i32_1 = arith.constant 0 : i32
    return %c0_i32, %c0_i32_0 : i32, i32
  }
  func.func @transform_7(%arg0: i32) -> (i32, i32) {
    %c0_i32 = arith.constant 0 : i32
    %c0_i32_0 = arith.constant 0 : i32
    %c0_i32_1 = arith.constant 0 : i32
    return %c0_i32, %c0_i32_0 : i32, i32
  }
  func.func @transform_8(%arg0: i32) -> (i32, i32) {
    %c0_i32 = arith.constant 0 : i32
    %c0_i32_0 = arith.constant 0 : i32
    %c0_i32_1 = arith.constant 0 : i32
    return %c0_i32, %c0_i32_0 : i32, i32
  }
  func.func @transform_9(%arg0: i32) -> (i32, i32) {
    %c0_i32 = arith.constant 0 : i32
    %c0_i32_0 = arith.constant 0 : i32
    return %arg0, %c0_i32 : i32, i32
  }
}

</mosaic_0001>

<bundles_post_ra>
// kernel: generator_forward.1
= control target key start
LH: loop header
LB: loop body
LE: loop exit
PB: predicated region body
PF: predicated region fallthrough
CT: control target
= control target key end

     0   :  { %14 = vsyncpa [#allocation3], 0  ;;  %s1135_s0 = inlined_call_operand.vmem [shape: f32[8,100], index: 0, kind: input, shape index: {}]   ;;  %s1136_s1 = inlined_call_operand.hbm [shape: f32[100,128], index: 1, kind: input, shape index: {}]   ;;  %s1137_s2 = inlined_call_operand.vmem [shape: f32[1,128], index: 2, kind: input, shape index: {}]   ;;  %s1138_s3 = inlined_call_operand.vmem [shape: f32[128,256], index: 3, kind: input, shape index: {}]   ;;  %s1139_s4 = inlined_call_operand.vmem [shape: f32[1,256], index: 4, kind: input, shape index: {}]   ;;  %s1140_s5 = inlined_call_operand.hbm [shape: f32[256,256], index: 5, kind: input, shape index: {}]   ;;  %s1141_s6 = inlined_call_operand.vmem [shape: f32[1,256], index: 6, kind: input, shape index: {}]   ;;  %s1142_s7 = inlined_call_operand.vmem [shape: f32[256,2], index: 7, kind: input, shape index: {}]   ;;  %s1143_s8 = inlined_call_operand.vmem [shape: f32[1,2], index: 8, kind: input, shape index: {}]   ;;  %s1144_s9 = inlined_call_operand.vmem [shape: f32[8,2], index: 9, kind: output, shape index: {}]  }
   0x1   :  { %15 = vsyncpa [#allocation5], 0  ;;  %s833_s30 = smov [#allocation2]   ;;  %s785_s13 = scalar_lea.hbm %s1136_s1, 1664 }
   0x2   :  { %s23_s10 = sshll.u32 %s833_s30, 4  ;;  %p786_p0 = scmp.ne.s32.totalorder %s1136_s1, %s785_s13  ;;  %s24_s10 = int_to_ptr.vmem [resolvable:$true] %s23_s10 }
   0x3   :  { %p789_p1 = scmp.lt.u32.totalorder %s785_s13, %s1136_s1 }
   0x5   :  { %p791_p2 = pnand %p789_p1, %p786_p0 }
   0x7   :  { %794 = shalt.err (!%p791_p2)
}
   0x8   :  { %s795_s18 = scalar_lea.vmem %s24_s10, 1664  ;;  %p800_p4 = scmp.lt.s32.totalorder %s24_s10, %s24_s10 }
   0x9   :  { %p796_p3 = scmp.ne.s32.totalorder %s24_s10, %s795_s18  ;;  %p801_p5 = scmp.lt.s32.totalorder %s795_s18, %s795_s18 }
   0xb   :  { %p802_p6 = por %p801_p5, %p800_p4 }
   0xd   :  { %p803_p7 = pnand %p802_p6, %p796_p3 }
   0xf   :  { %806 = shalt.err (!%p803_p7)
}
  0x10   :  { %s834_s19 = smov 128   ;;  %s835_s20 = smov 8  }
  0x11   :  { %29 = dma.hbm_to_vmem [thread:$0]  %s1136_s1, 1664, %s24_s10, [#allocation3], %s834_s19, %s834_s19, %s835_s20  }
  0x12   :  { %s836_s23 = smov [#allocation4]   ;;  %s807_s27 = scalar_lea.hbm %s1140_s5, 8192 }
  0x13   :  { %s41_s24 = sshll.u32 %s836_s23, 4  ;;  %p808_p8 = scmp.ne.s32.totalorder %s1140_s5, %s807_s27  ;;  %s42_s24 = int_to_ptr.vmem [resolvable:$true] %s41_s24 }
  0x14   :  { %p811_p9 = scmp.lt.u32.totalorder %s807_s27, %s1140_s5 }
  0x16   :  { %p813_p10 = pnand %p811_p9, %p808_p8 }
  0x18   :  { %816 = shalt.err (!%p813_p10)
}
  0x19   :  { %s817_s12 = scalar_lea.vmem %s42_s24, 8192  ;;  %p822_p12 = scmp.lt.s32.totalorder %s42_s24, %s42_s24 }
  0x1a   :  { %p818_p11 = scmp.ne.s32.totalorder %s42_s24, %s817_s12  ;;  %p823_p13 = scmp.lt.s32.totalorder %s817_s12, %s817_s12 }
  0x1c   :  { %p824_p0 = por %p823_p13, %p822_p12 }
  0x1e   :  { %p825_p1 = pnand %p824_p0, %p818_p11 }
  0x20   :  { %828 = shalt.err (!%p825_p1)
}
  0x21   :  { %s837_s1 = smov 256   ;;  %s838_s10 = smov 16  }
  0x22   :  { %47 = dma.hbm_to_vmem [thread:$0]  %s1140_s5, 8192, %s42_s24, [#allocation5], %s837_s1, %s837_s1, %s838_s10  }
  0x23   :  { %829 = dma.done.wait [#allocation3], 1664  }
  0x24   :  { %830 = vsyncadd [#allocation3], 4294965632 }
  0x25   :  { %831 = dma.done.wait [#allocation5], 8192  }
  0x26   :  { %832 = vsyncadd [#allocation5], 4294959104  ;;  %v839_v0 = vmov 0.0|0.0   ;;  %vm840_vm0 = vmmov 0   ;;  %v841_v1 = vmov 0.0   ;;  %v61_v2 = vld [vmem:[#allocation2] sm:$0xff] }
  0x27   :  { %630 = vmatprep.subr.bf16.mxu0 %v839_v0  ;;  %627 = vmatprep.mubr.msk.f32.mxu0 %vm840_vm0, %v841_v1  ;;  %v62_v3 = vld [vmem:[#allocation2 + $0x8] sm:$0xff]  ;;  %v63_v4 = vld [vmem:[#allocation2 + $0x10] sm:$0xff]  ;;  %v64_v6 = vld [vmem:[#allocation2 + $0x18] sm:$0xff]  ;;  %vm85_vm1 = vcmask 1043456   ;;  %vm81_vm2 = vcmask 818176   ;;  %vm540_vm3 = vcmask 15360  }
  0x28   :  { %269 = vmatprep.mubr.f32.mxu1 %v841_v1  ;;  %v631_v5 = vpack.c.bf16 %v62_v3, %v61_v2  ;;  %v634_v7 = vpack.c.bf16 %v64_v6, %v63_v4  ;;  %v65_v8 = vld [vmem:[#allocation2 + $0x20] sm:$0xff]  ;;  %v66_v9 = vld [vmem:[#allocation2 + $0x28] sm:$0xff]  ;;  %v164_v11 = vld [vmem:[%s1138_s3 + $0x18] sm:$0xff] }
  0x29   :  { %v162_v10 = vld [vmem:[%s1138_s3 + $0x8] sm:$0xff]  ;;  %v161_v12 = vld [vmem:[%s1138_s3] sm:$0xff]  ;;  %v163_v13 = vld [vmem:[%s1138_s3 + $0x10] sm:$0xff]  ;;  %v637_v19 = vpack.c.bf16 %v66_v9, %v65_v8 }
  0x2a   :  { %632 = vmatpush3.bf16.msra.mxu0 %v631_v5  ;;  %v648_v14 = vpack.c.bf16 %v164_v11, %v162_v10  ;;  %v650_v15 = vpack.c.bf16 %v163_v13, %v161_v12  ;;  %v166_v16 = vld [vmem:[%s1138_s3 + $0x28] sm:$0xff]  ;;  %v168_v17 = vld [vmem:[%s1138_s3 + $0x38] sm:$0xff]  ;;  %v165_v18 = vld [vmem:[%s1138_s3 + $0x20] sm:$0xff] }
  0x2b   :  { %633 = vmatprep.subr.bf16.mxu0 %v839_v0  ;;  %v652_v20 = vpack.c.bf16 %v168_v17, %v166_v16  ;;  %v167_v21 = vld [vmem:[%s1138_s3 + $0x30] sm:$0xff]  ;;  %v170_v22 = vld [vmem:[%s1138_s3 + $0x48] sm:$0xff]  ;;  %v172_v23 = vld [vmem:[%s1138_s3 + $0x58] sm:$0xff] }
  0x2c   :  { %v67_v24 = vld [vmem:[#allocation2 + $0x30] sm:$0xff]  ;;  %v68_v25 = vld [vmem:[#allocation2 + $0x38] sm:$0xff]  ;;  %649 = vmatprep.subr.bf16.mxu1 %v648_v14  ;;  %v654_v26 = vpack.c.bf16 %v167_v21, %v165_v18  ;;  %v656_v27 = vpack.c.bf16 %v172_v23, %v170_v22  ;;  %v169_v28 = vld [vmem:[%s1138_s3 + $0x40] sm:$0xff] }
  0x2d   :  { %651 = vmatpush1.bf16.msra.mxu1 %v650_v15  ;;  %v171_v29 = vld [vmem:[%s1138_s3 + $0x50] sm:$0xff]  ;;  %v640_v30 = vpack.c.bf16 %v68_v25, %v67_v24  ;;  %v174_v31 = vld [vmem:[%s1138_s3 + $0x68] sm:$0xff]  ;;  %v176_v32 = vld [vmem:[%s1138_s3 + $0x78] sm:$0xff] }
  0x2e   :  { %635 = vmatpush3.bf16.msra.mxu0 %v634_v7  ;;  %653 = vmatprep.subr.bf16.mxu1 %v652_v20  ;;  %v69_v33 = vld [vmem:[#allocation2 + $0x40] sm:$0xff]  ;;  %v70_v34 = vld [vmem:[#allocation2 + $0x48] sm:$0xff]  ;;  %v658_v35 = vpack.c.bf16 %v171_v29, %v169_v28  ;;  %v660_v36 = vpack.c.bf16 %v176_v32, %v174_v31  ;;  %v175_v38 = vld [vmem:[%s1138_s3 + $0x70] sm:$0xff] }
  0x2f   :  { %636 = vmatprep.subr.bf16.mxu0 %v839_v0  ;;  %v173_v37 = vld [vmem:[%s1138_s3 + $0x60] sm:$0xff]  ;;  %v643_v39 = vpack.c.bf16 %v70_v34, %v69_v33  ;;  %v178_v40 = vld [vmem:[%s1138_s3 + $0x88] sm:$0xff]  ;;  %v180_v41 = vld [vmem:[%s1138_s3 + $0x98] sm:$0xff] }
  0x30   :  { %v71_v42 = vld [vmem:[#allocation2 + $0x50] sm:$0xff]  ;;  %v72_v43 = vld [vmem:[#allocation2 + $0x58] sm:$0xff]  ;;  %v662_v44 = vpack.c.bf16 %v175_v38, %v173_v37  ;;  %v664_v45 = vpack.c.bf16 %v180_v41, %v178_v40  ;;  %v177_v46 = vld [vmem:[%s1138_s3 + $0x80] sm:$0xff] }
  0x31   :  { %655 = vmatpush1.bf16.msra.mxu1 %v654_v26  ;;  %v179_v47 = vld [vmem:[%s1138_s3 + $0x90] sm:$0xff]  ;;  %v646_v48 = vpack.c.bf16 %v72_v43, %v71_v42  ;;  %v182_v49 = vld [vmem:[%s1138_s3 + $0xa8] sm:$0xff]  ;;  %v184_v50 = vld [vmem:[%s1138_s3 + $0xb8] sm:$0xff] }
  0x32   :  { %638 = vmatpush3.bf16.msra.mxu0 %v637_v19  ;;  %657 = vmatprep.subr.bf16.mxu1 %v656_v27  ;;  %v666_v51 = vpack.c.bf16 %v179_v47, %v177_v46  ;;  %v668_v52 = vpack.c.bf16 %v184_v50, %v182_v49  ;;  %v181_v53 = vld [vmem:[%s1138_s3 + $0xa0] sm:$0xff]  ;;  %v183_v54 = vld [vmem:[%s1138_s3 + $0xb0] sm:$0xff]  ;;  %v186_v55 = vld [vmem:[%s1138_s3 + $0xc8] sm:$0xff] }
  0x33   :  { %639 = vmatprep.subr.bf16.mxu0 %v839_v0  ;;  %v188_v56 = vld [vmem:[%s1138_s3 + $0xd8] sm:$0xff]  ;;  %v73_v57 = vld [vmem:[#allocation2 + $0x60] sm:$0xf]  ;;  %v670_v59 = vpack.c.bf16 %v183_v54, %v181_v53  ;;  %v187_v62 = vld [vmem:[%s1138_s3 + $0xd0] sm:$0xff] }
  0x34   :  { %v60_v58 = vld [vmem:[%s1135_s0] sm:$0xff]  ;;  %v672_v60 = vpack.c.bf16 %v188_v56, %v186_v55  ;;  %v191_v4 = vld [vmem:[%s1138_s3 + $0xf0] sm:$0xff]  ;;  %v280_v8 = vld [vmem:[#allocation4] sm:$0xff] }
  0x35   :  { %659 = vmatpush1.bf16.msra.mxu1 %v658_v35  ;;  %v185_v61 = vld [vmem:[%s1138_s3 + $0xc0] sm:$0xff]  ;;  %v281_v6 = vld [vmem:[#allocation4 + $0x8] sm:$0xff]  ;;  %v282_v10 = vld [vmem:[#allocation4 + $0x10] sm:$0xff] }
  0x36   :  { %641 = vmatpush3.bf16.msra.mxu0 %v640_v30  ;;  %661 = vmatprep.subr.bf16.mxu1 %v660_v36  ;;  %v674_v63 = vpack.c.bf16 %v187_v62, %v185_v61  ;;  %v189_v3 = vld [vmem:[%s1138_s3 + $0xe0] sm:$0xff]  ;;  %v285_v11 = vld [vmem:[#allocation4 + $0x28] sm:$0xff]  ;;  %v682_v13 = vpack.c.bf16 %v282_v10, %v280_v8  ;;  %v284_v15 = vld [vmem:[#allocation4 + $0x20] sm:$0xff] }
  0x37   :  { %642 = vmatprep.subr.bf16.mxu0 %v839_v0  ;;  %v678_v5 = vpack.c.bf16 %v191_v4, %v189_v3  ;;  %v283_v7 = vld [vmem:[#allocation4 + $0x18] sm:$0xff]  ;;  %v286_v16 = vld [vmem:[#allocation4 + $0x30] sm:$0xff]  ;;  %v289_v17 = vld [vmem:[#allocation4 + $0x48] sm:$0xff] }
  0x38   :  { %v680_v9 = vpack.c.bf16 %v283_v7, %v281_v6  ;;  %v287_v12 = vld [vmem:[#allocation4 + $0x38] sm:$0xff]  ;;  %v686_v19 = vpack.c.bf16 %v286_v16, %v284_v15  ;;  %v288_v21 = vld [vmem:[#allocation4 + $0x40] sm:$0xff]  ;;  %v290_v22 = vld [vmem:[#allocation4 + $0x50] sm:$0xff] }
  0x39   :  { %663 = vmatpush1.bf16.msra.mxu1 %v662_v44  ;;  %v684_v14 = vpack.c.bf16 %v287_v12, %v285_v11  ;;  %v291_v18 = vld [vmem:[#allocation4 + $0x58] sm:$0xff]  ;;  %v293_v23 = vld [vmem:[#allocation4 + $0x68] sm:$0xff]  ;;  %v690_v25 = vpack.c.bf16 %v290_v22, %v288_v21  ;;  %v292_v27 = vld [vmem:[#allocation4 + $0x60] sm:$0xff] }
  0x3a   :  { %644 = vmatpush3.bf16.msra.mxu0 %v643_v39  ;;  %665 = vmatprep.subr.bf16.mxu1 %v664_v45  ;;  %v688_v20 = vpack.c.bf16 %v291_v18, %v289_v17  ;;  %v295_v24 = vld [vmem:[#allocation4 + $0x78] sm:$0xff]  ;;  %v294_v28 = vld [vmem:[#allocation4 + $0x70] sm:$0xff]  ;;  %v297_v29 = vld [vmem:[#allocation4 + $0x88] sm:$0xff] }
  0x3b   :  { %645 = vmatprep.subr.bf16.mxu0 %v839_v0  ;;  %v190_v0 = vld [vmem:[%s1138_s3 + $0xe8] sm:$0xff]  ;;  %v692_v26 = vpack.c.bf16 %v295_v24, %v293_v23  ;;  %v299_v30 = vld [vmem:[#allocation4 + $0x98] sm:$0xff]  ;;  %v694_v31 = vpack.c.bf16 %v294_v28, %v292_v27  ;;  %v298_v34 = vld [vmem:[#allocation4 + $0x90] sm:$0xff] }
  0x3c   :  { %v696_v32 = vpack.c.bf16 %v299_v30, %v297_v29  ;;  %v296_v33 = vld [vmem:[#allocation4 + $0x80] sm:$0xff]  ;;  %v301_v35 = vld [vmem:[#allocation4 + $0xa8] sm:$0xff]  ;;  %v303_v36 = vld [vmem:[#allocation4 + $0xb8] sm:$0xff] }
  0x3d   :  { %667 = vmatpush1.bf16.msra.mxu1 %v666_v51  ;;  %v698_v37 = vpack.c.bf16 %v298_v34, %v296_v33  ;;  %v700_v38 = vpack.c.bf16 %v303_v36, %v301_v35  ;;  %v300_v39 = vld [vmem:[#allocation4 + $0xa0] sm:$0xff]  ;;  %v302_v40 = vld [vmem:[#allocation4 + $0xb0] sm:$0xff]  ;;  %v305_v41 = vld [vmem:[#allocation4 + $0xc8] sm:$0xff] }
  0x3e   :  { %647 = vmatpush3.bf16.msra.mxu0 %v646_v48  ;;  %669 = vmatprep.subr.bf16.mxu1 %v668_v52  ;;  %v307_v42 = vld [vmem:[#allocation4 + $0xd8] sm:$0xff]  ;;  %v702_v43 = vpack.c.bf16 %v302_v40, %v300_v39  ;;  %v304_v45 = vld [vmem:[#allocation4 + $0xc0] sm:$0xff]  ;;  %v306_v46 = vld [vmem:[#allocation4 + $0xd0] sm:$0xff] }
  0x3f   :  { %625 = vmatprep.subr.mxu0 %v841_v1  ;;  %v192_v1 = vld [vmem:[%s1138_s3 + $0xf8] sm:$0xff]  ;;  %v704_v44 = vpack.c.bf16 %v307_v42, %v305_v41  ;;  %v309_v47 = vld [vmem:[#allocation4 + $0xe8] sm:$0xff]  ;;  %v311_v48 = vld [vmem:[#allocation4 + $0xf8] sm:$0xff]  ;;  %v706_v49 = vpack.c.bf16 %v306_v46, %v304_v45 }
  0x40   :  { %v676_v2 = vpack.c.bf16 %v192_v1, %v190_v0  ;;  %v708_v50 = vpack.c.bf16 %v311_v48, %v309_v47  ;;  %v308_v51 = vld [vmem:[#allocation4 + $0xe0] sm:$0xff]  ;;  %v310_v52 = vld [vmem:[#allocation4 + $0xf0] sm:$0xff]  ;;  %v313_v53 = vld [vmem:[#allocation4 + $0x108] sm:$0xff] }
  0x41   :  { %671 = vmatpush1.bf16.msra.mxu1 %v670_v59  ;;  %v315_v54 = vld [vmem:[#allocation4 + $0x118] sm:$0xff]  ;;  %v710_v55 = vpack.c.bf16 %v310_v52, %v308_v51  ;;  %v317_v59 = vld [vmem:[#allocation4 + $0x128] sm:$0xff]  ;;  %v318_v0 = vld [vmem:[#allocation4 + $0x130] sm:$0xff] }
  0x42   :  { %626 = vmatpush3.msk.msra.mxu0 %vm85_vm1, %v73_v57  ;;  %673 = vmatprep.subr.bf16.mxu1 %v672_v60  ;;  %v712_v56 = vpack.c.bf16 %v315_v54, %v313_v53  ;;  %v312_v57 = vld [vmem:[#allocation4 + $0x100] sm:$0xff]  ;;  %v319_v60 = vld [vmem:[#allocation4 + $0x138] sm:$0xff]  ;;  %v321_v1 = vld [vmem:[#allocation4 + $0x148] sm:$0xff] }
  0x43   :  { %628 = vmatmul.mubr.msk.f32.vlgmr.msra.gmra.mrb[0].mxu0 %vm81_vm2, %v60_v58  ;;  %681 = vmatprep.subr.bf16.mxu0 %v680_v9  ;;  %v314_v58 = vld [vmem:[#allocation4 + $0x110] sm:$0xff]  ;;  %v716_v62 = vpack.c.bf16 %v319_v60, %v317_v59  ;;  %v325_v7 = vld [vmem:[#allocation4 + $0x168] sm:$0xff]  ;;  %v327_v8 = vld [vmem:[#allocation4 + $0x178] sm:$0xff] }
  0x44   :  { %683 = vmatpush1.bf16.msra.mxu0 %v682_v13  ;;  %v714_v61 = vpack.c.bf16 %v314_v58, %v312_v57  ;;  %v322_v6 = vld [vmem:[#allocation4 + $0x150] sm:$0xff]  ;;  %v724_v10 = vpack.c.bf16 %v327_v8, %v325_v7  ;;  %v324_v11 = vld [vmem:[#allocation4 + $0x160] sm:$0xff]  ;;  %v329_v13 = vld [vmem:[#allocation4 + $0x188] sm:$0xff] }
  0x45   :  { %675 = vmatpush1.bf16.msra.mxu1 %v674_v63  ;;  %685 = vmatprep.subr.bf16.mxu0 %v684_v14  ;;  %v316_v63 = vld [vmem:[#allocation4 + $0x120] sm:$0xff]  ;;  %v326_v12 = vld [vmem:[#allocation4 + $0x170] sm:$0xff]  ;;  %v331_v14 = vld [vmem:[#allocation4 + $0x198] sm:$0xff] }
  0x46   :  { %677 = vmatprep.subr.bf16.mxu1 %v676_v2  ;;  %v323_v2 = vld [vmem:[#allocation4 + $0x158] sm:$0xff]  ;;  %v718_v3 = vpack.c.bf16 %v318_v0, %v316_v63  ;;  %v726_v15 = vpack.c.bf16 %v326_v12, %v324_v11  ;;  %v728_v16 = vpack.c.bf16 %v331_v14, %v329_v13  ;;  %v328_v17 = vld [vmem:[#allocation4 + $0x180] sm:$0xff]  ;;  %v330_v18 = vld [vmem:[#allocation4 + $0x190] sm:$0xff] }
  0x47   :  { %v720_v4 = vpack.c.bf16 %v323_v2, %v321_v1  ;;  %v730_v21 = vpack.c.bf16 %v330_v18, %v328_v17  ;;  %v332_v23 = vld [vmem:[#allocation4 + $0x1a0] sm:$0xff]  ;;  %v334_v24 = vld [vmem:[#allocation4 + $0x1b0] sm:$0xff]  ;;  %v339_v33 = vld [vmem:[#allocation4 + $0x1d8] sm:$0xff] }
  0x48   :  { %687 = vmatpush1.bf16.msra.mxu0 %v686_v19  ;;  %v333_v19 = vld [vmem:[#allocation4 + $0x1a8] sm:$0xff]  ;;  %v336_v35 = vld [vmem:[#allocation4 + $0x1c0] sm:$0xff]  ;;  %v338_v36 = vld [vmem:[#allocation4 + $0x1d0] sm:$0xff] }
  0x49   :  { %679 = vmatpush1.bf16.msra.mxu1 %v678_v5  ;;  %689 = vmatprep.subr.bf16.mxu0 %v688_v20  ;;  %v320_v5 = vld [vmem:[#allocation4 + $0x140] sm:$0xff]  ;;  %v335_v20 = vld [vmem:[#allocation4 + $0x1b8] sm:$0xff]  ;;  %v342_v42 = vld [vmem:[#allocation4 + $0x1f0] sm:$0xff] }
  0x4a   :  { %v722_v9 = vpack.c.bf16 %v322_v6, %v320_v5  ;;  %v732_v22 = vpack.c.bf16 %v335_v20, %v333_v19  ;;  %v343_v39 = vld [vmem:[#allocation4 + $0x1f8] sm:$0xff]  ;;  %v340_v41 = vld [vmem:[#allocation4 + $0x1e0] sm:$0xff]  ;;  %v433_v53 = vld [vmem:[%s1142_s7 + $0x10] sm:$0xff] }
  0x4b   :  { %v448_v45 = vld [vmem:[%s1142_s7 + $0x88] sm:$0xff]  ;;  %v431_v46 = vld [vmem:[%s1142_s7] sm:$0xff]  ;;  %v434_v54 = vld [vmem:[%s1142_s7 + $0x18] sm:$0xff] }
  0x4c   :  { %691 = vmatpush1.bf16.msra.mxu0 %v690_v25  ;;  %v734_v25 = vpack.c.bf16 %v334_v24, %v332_v23  ;;  %v432_v48 = vld [vmem:[%s1142_s7 + $0x8] sm:$0xff]  ;;  %v750_v57 = vpack.c.bf16 %v434_v54, %v433_v53  ;;  %v435_v59 = vld [vmem:[%s1142_s7 + $0x20] sm:$0xff]  ;;  %v437_v1 = vld [vmem:[%s1142_s7 + $0x30] sm:$0xff] }
  0x4d   :  { %693 = vmatprep.subr.bf16.mxu0 %v692_v26  ;;  %v548_v26 = vld [vmem:[%s1137_s2] ss:$0 sm:$0xff]  ;;  %v746_v51 = vpack.c.bf16 %v432_v48, %v431_v46  ;;  %v436_v60 = vld [vmem:[%s1142_s7 + $0x28] sm:$0xff]  ;;  %v438_v2 = vld [vmem:[%s1142_s7 + $0x38] sm:$0xff] }
  0x4e   :  { %v754_v63 = vpack.c.bf16 %v436_v60, %v435_v59  ;;  %v758_v5 = vpack.c.bf16 %v438_v2, %v437_v1  ;;  %v439_v7 = vld [vmem:[%s1142_s7 + $0x40] sm:$0xff]  ;;  %v440_v8 = vld [vmem:[%s1142_s7 + $0x48] sm:$0xff]  ;;  %v441_v13 = vld [vmem:[%s1142_s7 + $0x50] sm:$0xff] }
  0x4f   :  { %v762_v11 = vpack.c.bf16 %v440_v8, %v439_v7  ;;  %v442_v14 = vld [vmem:[%s1142_s7 + $0x58] sm:$0xff]  ;;  %v193_v19 = vld [vmem:[%s1139_s4] sm:$0x3] }
  0x50   :  { %695 = vmatpush1.bf16.msra.mxu0 %v694_v31 }
  0x51   :  { %697 = vmatprep.subr.bf16.mxu0 %v696_v32  ;;  %v337_v32 = vld [vmem:[#allocation4 + $0x1c8] sm:$0xff] }
  0x52   :  { %v736_v34 = vpack.c.bf16 %v339_v33, %v337_v32  ;;  %v460_v32 = vld [vmem:[%s1142_s7 + $0xe8] sm:$0xff] }
  0x54   :  { %699 = vmatpush1.bf16.msra.mxu0 %v698_v37  ;;  %v738_v37 = vpack.c.bf16 %v338_v36, %v336_v35  ;;  %v444_v35 = vld [vmem:[%s1142_s7 + $0x68] sm:$0xff] }
  0x55   :  { %701 = vmatprep.subr.bf16.mxu0 %v700_v38  ;;  %v341_v38 = vld [vmem:[#allocation4 + $0x1e8] sm:$0xff] }
  0x56   :  { %v740_v40 = vpack.c.bf16 %v343_v39, %v341_v38  ;;  %v462_v38 = vld [vmem:[%s1142_s7 + $0xf8] sm:$0xff] }
  0x58   :  { %703 = vmatpush1.bf16.msra.mxu0 %v702_v43  ;;  %v742_v43 = vpack.c.bf16 %v342_v42, %v340_v41  ;;  %v446_v41 = vld [vmem:[%s1142_s7 + $0x78] sm:$0xff] }
  0x59   :  { %705 = vmatprep.subr.bf16.mxu0 %v704_v44  ;;  %v447_v44 = vld [vmem:[%s1142_s7 + $0x80] sm:$0xff] }
  0x5a   :  { %v744_v47 = vpack.c.bf16 %v448_v45, %v447_v44 }
  0x5c   :  { %707 = vmatpush1.bf16.msra.mxu0 %v706_v49  ;;  %v449_v49 = vld [vmem:[%s1142_s7 + $0x90] sm:$0xff]  ;;  %745 = vmatprep.subr.bf16.mxu1 %v744_v47 }
  0x5d   :  { %709 = vmatprep.subr.bf16.mxu0 %v708_v50  ;;  %v450_v50 = vld [vmem:[%s1142_s7 + $0x98] sm:$0xff] }
  0x5e   :  { %v748_v52 = vpack.c.bf16 %v450_v50, %v449_v49 }
  0x60   :  { %711 = vmatpush1.bf16.msra.mxu0 %v710_v55  ;;  %v451_v55 = vld [vmem:[%s1142_s7 + $0xa0] sm:$0xff] }
  0x61   :  { %713 = vmatprep.subr.bf16.mxu0 %v712_v56  ;;  %v452_v56 = vld [vmem:[%s1142_s7 + $0xa8] sm:$0xff] }
  0x62   :  { %v752_v58 = vpack.c.bf16 %v452_v56, %v451_v55  ;;  %v551_v55 = vld [vmem:[%s1143_s8] ss:$0 sm:$0xff] }
  0x64   :  { %715 = vmatpush1.bf16.msra.mxu0 %v714_v61  ;;  %v453_v61 = vld [vmem:[%s1142_s7 + $0xb0] sm:$0xff] }
  0x65   :  { %717 = vmatprep.subr.bf16.mxu0 %v716_v62  ;;  %v454_v62 = vld [vmem:[%s1142_s7 + $0xb8] sm:$0xff] }
  0x66   :  { %v756_v0 = vpack.c.bf16 %v454_v62, %v453_v61 }
  0x68   :  { %719 = vmatpush1.bf16.msra.mxu0 %v718_v3  ;;  %v455_v3 = vld [vmem:[%s1142_s7 + $0xc0] sm:$0xff] }
  0x69   :  { %721 = vmatprep.subr.bf16.mxu0 %v720_v4  ;;  %v456_v4 = vld [vmem:[%s1142_s7 + $0xc8] sm:$0xff] }
  0x6a   :  { %v760_v6 = vpack.c.bf16 %v456_v4, %v455_v3 }
  0x6c   :  { %723 = vmatpush1.bf16.msra.mxu0 %v722_v9  ;;  %v457_v9 = vld [vmem:[%s1142_s7 + $0xd0] sm:$0xff] }
  0x6d   :  { %725 = vmatprep.subr.bf16.mxu0 %v724_v10  ;;  %v458_v10 = vld [vmem:[%s1142_s7 + $0xd8] sm:$0xff] }
  0x6e   :  { %v764_v12 = vpack.c.bf16 %v458_v10, %v457_v9 }
  0x70   :  { %727 = vmatpush1.bf16.msra.mxu0 %v726_v15  ;;  %v766_v15 = vpack.c.bf16 %v442_v14, %v441_v13 }
  0x71   :  { %729 = vmatprep.subr.bf16.mxu0 %v728_v16  ;;  %v195_v16 = vlaneseq }
  0x73   :  { %v196_v17 = vshrl.u32 %v195_v16, 7 }
  0x74   :  { %731 = vmatpush1.bf16.msra.mxu0 %v730_v21 }
  0x75   :  { %733 = vmatprep.subr.bf16.mxu0 %v732_v22  ;;  %v197_v18 = vsub.s32 0, %v196_v17  ;;  %v201_v20 = vsub.s32 1, %v196_v17 }
  0x77   :  { %v198_v21 = vrot.slane %v193_v19, %v197_v18  ;;  %v202_v22 = vrot.slane %v193_v19, %v201_v20 }
  0x78   :  { %735 = vmatpush1.bf16.msra.mxu0 %v734_v25 }
  0x79   :  { %737 = vmatprep.subr.bf16.mxu0 %v736_v34  ;;  %v443_v34 = vld [vmem:[%s1142_s7 + $0x60] sm:$0xff] }
  0x7a   :  { %v770_v36 = vpack.c.bf16 %v444_v35, %v443_v34 }
  0x7c   :  { %739 = vmatpush1.bf16.msra.mxu0 %v738_v37  ;;  %v461_v37 = vld [vmem:[%s1142_s7 + $0xf0] sm:$0xff] }
  0x7d   :  { %741 = vmatprep.subr.bf16.mxu0 %v740_v40  ;;  %v772_v39 = vpack.c.bf16 %v462_v38, %v461_v37  ;;  %v445_v40 = vld [vmem:[%s1142_s7 + $0x70] sm:$0xff] }
  0x7e   :  { %v774_v42 = vpack.c.bf16 %v446_v41, %v445_v40 }
  0x80   :  { %743 = vmatpush1.bf16.msra.mxu0 %v742_v43  ;;  %v344_v43 = vld [vmem:[%s1141_s6] sm:$0x3] }
  0x81   :  { %v349_v44 = vrot.slane %v344_v43, %v197_v18  ;;  %v353_v45 = vrot.slane %v344_v43, %v201_v20 }
 0x116   :  { %v155_v27 = vpop.f32.mrb[0].mxu0 }
 0x117   :  { %v156_v28 = vadd.f32 %v548_v26, %v155_v27  ;;  %v629_v29 = vpop.f32.mrb[1].mxu0 }
 0x119   :  { %v159_v30 = vmul.f32 0.2, %v156_v28 }
 0x11b   :  { %v160_v31 = vmax.f32 %v156_v28, %v159_v30 }
 0x11d   :  { %270 = vmatmul.mubr.f32.vlgmr.msra.gmra.mrb[0].mxu1 %v160_v31  ;;  %v459_v31 = vld [vmem:[%s1142_s7 + $0xe0] sm:$0xff] }
 0x11e   :  { %747 = vmatpush3.bf16.msra.mxu1 %v746_v51  ;;  %v768_v33 = vpack.c.bf16 %v460_v32, %v459_v31 }
 0x11f   :  { %749 = vmatprep.subr.bf16.mxu1 %v748_v52 }
 0x122   :  { %751 = vmatpush3.bf16.msra.mxu1 %v750_v57 }
 0x123   :  { %753 = vmatprep.subr.bf16.mxu1 %v752_v58 }
 0x126   :  { %755 = vmatpush3.bf16.msra.mxu1 %v754_v63 }
 0x127   :  { %757 = vmatprep.subr.bf16.mxu1 %v756_v0 }
 0x12a   :  { %759 = vmatpush3.bf16.msra.mxu1 %v758_v5 }
 0x12b   :  { %761 = vmatprep.subr.bf16.mxu1 %v760_v6 }
 0x12e   :  { %763 = vmatpush3.bf16.msra.mxu1 %v762_v11 }
 0x12f   :  { %765 = vmatprep.subr.bf16.mxu1 %v764_v12 }
 0x132   :  { %767 = vmatpush3.bf16.msra.mxu1 %v766_v15 }
 0x133   :  { %769 = vmatprep.subr.bf16.mxu1 %v768_v33 }
 0x136   :  { %771 = vmatpush3.bf16.msra.mxu1 %v770_v36 }
 0x137   :  { %773 = vmatprep.subr.bf16.mxu1 %v772_v39 }
 0x13a   :  { %775 = vmatpush3.bf16.msra.mxu1 %v774_v42 }
 0x1f0   :  { %v271_v23 = vpop.f32.mrb[0].mxu1 }
 0x1f1   :  { %v272_v24 = vadd.f32 %v271_v23, %v198_v21  ;;  %v273_v25 = vpop.f32.mrb[1].mxu1 }
 0x1f2   :  { %v274_v26 = vadd.f32 %v273_v25, %v202_v22 }
 0x1f3   :  { %v276_v27 = vmul.f32 0.2, %v272_v24 }
 0x1f4   :  { %v277_v28 = vmul.f32 0.2, %v274_v26 }
 0x1f5   :  { %v278_v30 = vmax.f32 %v272_v24, %v276_v27 }
 0x1f6   :  { %v279_v29 = vmax.f32 %v274_v26, %v277_v28 }
 0x1f8   :  { %420 = vmatprep.mubr.f32.mxu0 %v279_v29 }
 0x1f9   :  { %421 = vmatmul.mubr.f32.vlgmr.msra.gmra.mrb[2].mxu0 %v278_v30 }
 0x2cc   :  { %v422_v46 = vpop.f32.mrb[2].mxu0 }
 0x2cd   :  { %v423_v47 = vadd.f32 %v422_v46, %v349_v44  ;;  %v424_v48 = vpop.f32.mrb[3].mxu0 }
 0x2ce   :  { %v425_v49 = vadd.f32 %v424_v48, %v353_v45 }
 0x2cf   :  { %v427_v50 = vmul.f32 0.2, %v423_v47 }
 0x2d0   :  { %v428_v51 = vmul.f32 0.2, %v425_v49 }
 0x2d1   :  { %v429_v53 = vmax.f32 %v423_v47, %v427_v50 }
 0x2d2   :  { %v430_v52 = vmax.f32 %v425_v49, %v428_v51 }
 0x2d4   :  { %534 = vmatprep.mubr.f32.mxu1 %v430_v52 }
 0x2d5   :  { %535 = vmatmul.mubr.f32.vlgmr.msra.gmra.mrb[2].mxu1 %v429_v53 }
 0x3a8   :  { %v598_v54 = vpop.f32.mrb[2].mxu1 }
 0x3a9   :  { %v599_v56 = vpop.f32.mrb[3].mxu1 }
 0x3aa   :  { %v600_v57 = vadd.f32 %v599_v56, %v598_v54 }
 0x3ac   :  { %v537_v58 = vadd.f32 %v600_v57, %v551_v55 }
 0x3ae   :  { %541 = vst.msk [vmem:[%s1144_s9] sm:$0xff] %vm540_vm3, %v537_v58 }
 0x3af   :  { %546 = vsyncpa [#allocation3], 1 }
 0x3b0   :  { %547 = vsyncpa [#allocation5], 1 }

</bundles_post_ra>
